<compile_context>
chip_gen: v6e
topology: v6e:2x2x1
jax: 0.10.0
libtpu: 0.0.40
codegen_flags: <defaults>
</compile_context>

<pallas_src>
import functools

import jax
import jax.numpy as jnp
import numpy as np
from jax import lax
from jax.experimental import pallas as pl
from jax.experimental.pallas import tpu as pltpu


# ---------------------------------------------------------------------------
# Kernels
# ---------------------------------------------------------------------------

def _ws_kernel(x_ref, tl_ref, tr_ref, w_ref, b_ref, o_ref, *, mm_dtype):
    """Weight-resident variant. Grid = (B, F_tiles, S_tiles), S innermost.

    x_ref  : (1, bs, nx)  x tile for batch b (native dtype)
    tl_ref : (1, 1, nx)   tmp_L row for batch b (f32)
    tr_ref : (1, 1, bf)   tmp_R row for batch b (f32)
    w_ref  : (bf, nx)     weight tile, (nf, nx) layout (resident across s)
    b_ref  : (1, bf)      bias tile (f32)
    o_ref  : (1, bs, bf)  output tile
    """
    # Scale by tmp_L in f32 (v5e has no bf16 VALU); downcast only the dot inputs.
    xs = (x_ref[0].astype(jnp.float32) * tl_ref[0]).astype(mm_dtype)      # (bs, nx)
    acc = lax.dot_general(xs, w_ref[...],
                          dimension_numbers=(((1,), (1,)), ((), ())),     # x @ W^T
                          preferred_element_type=jnp.float32)             # (bs, bf)
    o_ref[0] = (acc * tr_ref[0] + b_ref[...]).astype(o_ref.dtype)


def _kt_kernel(x_ref, tl_ref, tr_ref, w_ref, b_ref, o_ref, acc_ref, *, mm_dtype):
    """K-tiled fallback. Grid = (B, F_tiles, S_tiles, K_tiles); K innermost.

    x_ref  : (1, bs, bk)   tl_ref : (1, 1, bk)   tr_ref : (1, 1, bf)
    w_ref  : (bf, bk)      b_ref  : (1, bf)      o_ref  : (1, bs, bf)
    acc_ref: (bs, bf) f32 accumulator scratch
    """
    k = pl.program_id(3)

    @pl.when(k == 0)
    def _init():
        acc_ref[...] = jnp.zeros_like(acc_ref)

    xs = (x_ref[0].astype(jnp.float32) * tl_ref[0]).astype(mm_dtype)      # (bs, bk)
    acc_ref[...] += lax.dot_general(xs, w_ref[...],
                                    dimension_numbers=(((1,), (1,)), ((), ())),
                                    preferred_element_type=jnp.float32)

    @pl.when(k == pl.num_programs(3) - 1)
    def _finalize():
        o_ref[0] = (acc_ref[...] * tr_ref[0] + b_ref[...]).astype(o_ref.dtype)


# ---------------------------------------------------------------------------
# Wrapper
# ---------------------------------------------------------------------------

def _pick_tile(dim, target, quanta):
    """Full dim if small; otherwise the largest multiple of a preferred quantum
    (tried in order) <= target that divides `dim`; falls back to the full dim."""
    if dim <= target:
        return dim
    for q in quanta:
        t = (target // q) * q
        while t >= q:
            if dim % t == 0:
                return t
            t -= q
    return dim


def conv1d_style_forward(x, cluster, weight, bias, style_L, style_R, *,
                         matmul_dtype=jnp.bfloat16,
                         block_s=512, block_f=512, block_k=512,
                         vmem_budget_bytes=48 * 1024 * 1024):
    """x: (B, S, nx), cluster: (B, K), weight: (nf, nx), bias: (nf,),
    style_L: (K, nx), style_R: (K, nf)  ->  (B, S, nf)"""
    B, S, nx = x.shape
    nf = weight.shape[0]

    # Tiny rank-K style matmuls (K ~ 4) hoisted to the wrapper, f32.
    cl = cluster.astype(jnp.float32)
    tmp_L = cl @ style_L.astype(jnp.float32)          # (B, nx)
    tmp_R = cl @ style_R.astype(jnp.float32)          # (B, nf)
    tl3 = tmp_L[:, None, :]                           # (B, 1, nx) f32
    tr3 = tmp_R[:, None, :]                           # (B, 1, nf) f32
    b2 = bias.astype(jnp.float32).reshape(1, nf)      # (1, nf)   f32

    # Weight stays (nf, nx): no HBM transpose; the kernel contracts on dim 1.
    w = weight.astype(matmul_dtype)

    bs = _pick_tile(S, block_s, (256, 8))             # sublane (row) tile
    bf = _pick_tile(nf, block_f, (256, 128))          # lane (output) tile

    x_isz = jnp.dtype(x.dtype).itemsize
    w_isz = jnp.dtype(matmul_dtype).itemsize
    o_isz = x_isz

    # Double-buffered tile footprint of the weight-resident variant.
    ws_bytes = (2 * (bs * nx * x_isz + bf * nx * w_isz + bs * bf * o_isz)
                + 2 * (nx + 2 * bf) * 4)
    use_weight_resident = ws_bytes <= vmem_budget_bytes

    if use_weight_resident:
        grid = (B, nf // bf, S // bs)
        vmem_est = ws_bytes
        kernel = functools.partial(_ws_kernel, mm_dtype=matmul_dtype)
        grid_spec = pltpu.PrefetchScalarGridSpec(
            num_scalar_prefetch=0,
            grid=grid,
            in_specs=[
                pl.BlockSpec((1, bs, nx), lambda b, f, s: (b, s, 0)),   # x
                pl.BlockSpec((1, 1, nx), lambda b, f, s: (b, 0, 0)),    # tmp_L row
                pl.BlockSpec((1, 1, bf), lambda b, f, s: (b, 0, f)),    # tmp_R row
                pl.BlockSpec((bf, nx), lambda b, f, s: (f, 0)),         # weight (s-invariant)
                pl.BlockSpec((1, bf), lambda b, f, s: (0, f)),          # bias
            ],
            out_specs=pl.BlockSpec((1, bs, bf), lambda b, f, s: (b, s, f)),
            scratch_shapes=[],
        )
        dim_sem = ("parallel", "parallel", "arbitrary")
    else:
        bk = _pick_tile(nx, block_k, (256, 128))      # reduction tile
        grid = (B, nf // bf, S // bs, nx // bk)
        vmem_est = (2 * (bs * bk * x_isz + bf * bk * w_isz + bs * bf * o_isz)
                    + bs * bf * 4 + 2 * (bk + 2 * bf) * 4)
        kernel = functools.partial(_kt_kernel, mm_dtype=matmul_dtype)
        grid_spec = pltpu.PrefetchScalarGridSpec(
            num_scalar_prefetch=0,
            grid=grid,
            in_specs=[
                pl.BlockSpec((1, bs, bk), lambda b, f, s, k: (b, s, k)),  # x
                pl.BlockSpec((1, 1, bk), lambda b, f, s, k: (b, 0, k)),   # tmp_L
                pl.BlockSpec((1, 1, bf), lambda b, f, s, k: (b, 0, f)),   # tmp_R
                pl.BlockSpec((bf, bk), lambda b, f, s, k: (f, k)),        # weight
                pl.BlockSpec((1, bf), lambda b, f, s, k: (0, f)),         # bias
            ],
            out_specs=pl.BlockSpec((1, bs, bf), lambda b, f, s, k: (b, s, f)),
            scratch_shapes=[pltpu.VMEM((bs, bf), jnp.float32)],
        )
        dim_sem = ("parallel", "parallel", "parallel", "arbitrary")

    # Explicit VMEM budget; capped so it is valid on v7x (64 MiB physical) too.
    vmem_limit = int(min(60 * 1024 * 1024,
                         max(32 * 1024 * 1024, int(vmem_est * 1.3) + (2 << 20))))

    return pl.pallas_call(
        kernel,
        out_shape=jax.ShapeDtypeStruct((B, S, nf), x.dtype),
        grid_spec=grid_spec,
        compiler_params=pltpu.CompilerParams(
            dimension_semantics=dim_sem,
            vmem_limit_bytes=vmem_limit),
    )(x, tl3, tr3, w, b2)


# ---------------------------------------------------------------------------
# Reference & test harness
# ---------------------------------------------------------------------------

def conv1d_style_reference(x, cluster, weight, bias, style_L, style_R):
    """Pure-JAX reference mirroring the PyTorch forward literally."""
    tmp_L = cluster @ style_L                               # (B, nx)
    tmp_R = cluster @ style_R                               # (B, nf)
    gamma = tmp_L[:, :, None] * tmp_R[:, None, :]           # (B, nx, nf)
    new_w = jnp.transpose(weight)[None, :, :] * gamma       # (B, nx, nf)
    return jnp.einsum("bsn,bnf->bsf", x, new_w) + bias[None, None, :]


def _make_inputs(key, B, S, nx, nf, K):
    k_w, k_x, k_c, k_sl, k_sr = jax.random.split(key, 5)
    # Module init: weight ~ N(0, 0.02), bias = 0, style_L/R = ones; perturb the
    # style params slightly so the style path is exercised numerically.
    weight = 0.02 * jax.random.normal(k_w, (nf, nx), dtype=jnp.float32)
    bias = jnp.zeros((nf,), dtype=jnp.float32)
    style_L = jnp.ones((K, nx), jnp.float32) + 0.1 * jax.random.normal(k_sl, (K, nx), dtype=jnp.float32)
    style_R = jnp.ones((K, nf), jnp.float32) + 0.1 * jax.random.normal(k_sr, (K, nf), dtype=jnp.float32)
    x = jax.random.normal(k_x, (B, S, nx), dtype=jnp.float32)
    cluster = jax.nn.softmax(jax.random.normal(k_c, (B, K), dtype=jnp.float32), axis=-1)
    return x, cluster, weight, bias, style_L, style_R


if __name__ == "__main__":
    key = jax.random.PRNGKey(0)
    k1, k2 = jax.random.split(key)

    # Small shapes implied by the module: x (B, S, nx), cluster (B, K).
    args_small = _make_inputs(k1, B=2, S=8, nx=32, nf=64, K=4)

    # Exact-semantics check: f32 MXU path vs the literal reference.
    y_exact = jax.block_until_ready(
        conv1d_style_forward(*args_small, matmul_dtype=jnp.float32))
    np.testing.assert_allclose(np.asarray(y_exact),
                               np.asarray(conv1d_style_reference(*args_small)),
                               rtol=1e-4, atol=1e-5)

    # Default path: bf16 MXU operands, f32 accumulate/epilogue.
    y_small = jax.block_until_ready(conv1d_style_forward(*args_small))
    np.testing.assert_allclose(np.asarray(y_small),
                               np.asarray(conv1d_style_reference(*args_small)),
                               rtol=2e-2, atol=2e-2)

    # Moderate shape: exercises the weight-resident path with real tiles.
    args_big = _make_inputs(k2, B=2, S=512, nx=1024, nf=256, K=4)
    y_big = jax.block_until_ready(conv1d_style_forward(*args_big))
    np.testing.assert_allclose(np.asarray(y_big),
                               np.asarray(conv1d_style_reference(*args_big)),
                               rtol=2e-2, atol=2e-2)

    # Force the K-tiled fallback (tiny VMEM budget) to cover that path too.
    y_kt = jax.block_until_ready(
        conv1d_style_forward(*args_big, vmem_budget_bytes=2 * 1024 * 1024))
    np.testing.assert_allclose(np.asarray(y_kt),
                               np.asarray(conv1d_style_reference(*args_big)),
                               rtol=2e-2, atol=2e-2)

    print("KERNEL_OK")
</pallas_src>

<mosaic_0001>
module attributes {stable_mosaic.version = 11 : i64} {
  func.func @_ws_kernel(%arg0: i32, %arg1: i32, %arg2: i32, %arg3: memref<1x8x32xf32, #tpu.memory_space<vmem>>, %arg4: memref<1x1x32xf32, #tpu.memory_space<vmem>>, %arg5: memref<1x1x64xf32, #tpu.memory_space<vmem>>, %arg6: memref<64x32xf32, #tpu.memory_space<vmem>>, %arg7: memref<1x64xf32, #tpu.memory_space<vmem>>, %arg8: memref<1x8x64xf32, #tpu.memory_space<vmem>>) attributes {dimension_semantics = [#tpu.dimension_semantics<parallel>, #tpu.dimension_semantics<parallel>, #tpu.dimension_semantics<arbitrary>], iteration_bounds = array<i64: 2, 1, 1>, scalar_prefetch = 0 : i64, scratch_operands = 0 : i64, tpu.core_type = #tpu.core_type<tc>, window_params = [{transform_indices = @transform_0, window_bounds = array<i64: 1, 8, 32>}, {transform_indices = @transform_1, window_bounds = array<i64: 1, 1, 32>}, {transform_indices = @transform_2, window_bounds = array<i64: 1, 1, 64>}, {transform_indices = @transform_3, window_bounds = array<i64: 64, 32>}, {transform_indices = @transform_4, window_bounds = array<i64: 1, 64>}, {transform_indices = @transform_5, window_bounds = array<i64: 1, 8, 64>}]} {
    %c0 = arith.constant 0 : index
    %c0_0 = arith.constant 0 : index
    %c0_1 = arith.constant 0 : index
    %0 = vector.load %arg3[%c0, %c0_0, %c0_1] : memref<1x8x32xf32, #tpu.memory_space<vmem>>, vector<1x8x32xf32>
    %1 = vector.shape_cast %0 : vector<1x8x32xf32> to vector<8x32xf32>
    %c0_2 = arith.constant 0 : index
    %c0_3 = arith.constant 0 : index
    %c0_4 = arith.constant 0 : index
    %2 = vector.load %arg4[%c0_2, %c0_3, %c0_4] : memref<1x1x32xf32, #tpu.memory_space<vmem>>, vector<1x1x32xf32>
    %3 = vector.shape_cast %2 : vector<1x1x32xf32> to vector<1x32xf32>
    %4 = vector.broadcast %3 : vector<1x32xf32> to vector<8x32xf32>
    %5 = arith.mulf %1, %4 : vector<8x32xf32>
    %c0_5 = arith.constant 0 : index
    %c0_6 = arith.constant 0 : index
    %6 = vector.load %arg6[%c0_5, %c0_6] : memref<64x32xf32, #tpu.memory_space<vmem>>, vector<64x32xf32>
    %cst = arith.constant dense<0.000000e+00> : vector<8x64xf32>
    %7 = tpu.matmul %5, %6, %cst {dimension_numbers = #tpu.dot_dimension_numbers<[1], [1], [0], [0], [0, 0, 1, 0], [], []>} : vector<8x32xf32>, vector<64x32xf32>, vector<8x64xf32> -> vector<8x64xf32>
    %c0_7 = arith.constant 0 : index
    %c0_8 = arith.constant 0 : index
    %c0_9 = arith.constant 0 : index
    %8 = vector.load %arg5[%c0_7, %c0_8, %c0_9] : memref<1x1x64xf32, #tpu.memory_space<vmem>>, vector<1x1x64xf32>
    %9 = vector.shape_cast %8 : vector<1x1x64xf32> to vector<1x64xf32>
    %10 = vector.broadcast %9 : vector<1x64xf32> to vector<8x64xf32>
    %11 = arith.mulf %7, %10 : vector<8x64xf32>
    %c0_10 = arith.constant 0 : index
    %c0_11 = arith.constant 0 : index
    %12 = vector.load %arg7[%c0_10, %c0_11] : memref<1x64xf32, #tpu.memory_space<vmem>>, vector<1x64xf32>
    %13 = vector.broadcast %12 : vector<1x64xf32> to vector<8x64xf32>
    %14 = arith.addf %11, %13 : vector<8x64xf32>
    %c0_12 = arith.constant 0 : index
    %c0_13 = arith.constant 0 : index
    %c0_14 = arith.constant 0 : index
    %15 = vector.load %arg8[%c0_12, %c0_13, %c0_14] : memref<1x8x64xf32, #tpu.memory_space<vmem>>, vector<1x8x64xf32>
    %16 = vector.shape_cast %15 : vector<1x8x64xf32> to vector<8x64xf32>
    %17 = vector.shape_cast %14 : vector<8x64xf32> to vector<1x8x64xf32>
    tpu.vector_store %arg8[%c0_12, %c0_13, %c0_14], %17 {strides = array<i32>} : memref<1x8x64xf32, #tpu.memory_space<vmem>>, vector<1x8x64xf32>,
    return
  }
  func.func @transform_0(%arg0: i32, %arg1: i32, %arg2: i32) -> (i32, i32, i32) {
    %c0_i32 = arith.constant 0 : i32
    %c0_i32_0 = arith.constant 0 : i32
    return %arg0, %arg2, %c0_i32 : i32, i32, i32
  }
  func.func @transform_1(%arg0: i32, %arg1: i32, %arg2: i32) -> (i32, i32, i32) {
    %c0_i32 = arith.constant 0 : i32
    %c0_i32_0 = arith.constant 0 : i32
    %c0_i32_1 = arith.constant 0 : i32
    return %arg0, %c0_i32, %c0_i32_0 : i32, i32, i32
  }
  func.func @transform_2(%arg0: i32, %arg1: i32, %arg2: i32) -> (i32, i32, i32) {
    %c0_i32 = arith.constant 0 : i32
    %c0_i32_0 = arith.constant 0 : i32
    return %arg0, %c0_i32, %arg1 : i32, i32, i32
  }
  func.func @transform_3(%arg0: i32, %arg1: i32, %arg2: i32) -> (i32, i32) {
    %c0_i32 = arith.constant 0 : i32
    %c0_i32_0 = arith.constant 0 : i32
    return %arg1, %c0_i32 : i32, i32
  }
  func.func @transform_4(%arg0: i32, %arg1: i32, %arg2: i32) -> (i32, i32) {
    %c0_i32 = arith.constant 0 : i32
    %c0_i32_0 = arith.constant 0 : i32
    return %c0_i32, %arg1 : i32, i32
  }
  func.func @transform_5(%arg0: i32, %arg1: i32, %arg2: i32) -> (i32, i32, i32) {
    %c0_i32 = arith.constant 0 : i32
    return %arg0, %arg2, %arg1 : i32, i32, i32
  }
}

</mosaic_0001>

<bundles_post_ra>
// kernel: tpu_custom_call.1
= control target key start
LH: loop header
LB: loop body
LE: loop exit
PB: predicated region body
PF: predicated region fallthrough
CT: control target
= control target key end

     0   :  { %10 = vsyncpa [#allocation3], 0  ;;  %s963_s0 = inlined_call_operand.vmem [shape: f32[2,8,32], index: 0, kind: input, shape index: {}]   ;;  %s964_s1 = inlined_call_operand.vmem [shape: f32[2,1,32], index: 1, kind: input, shape index: {}]   ;;  %s965_s2 = inlined_call_operand.vmem [shape: f32[2,1,64], index: 2, kind: input, shape index: {}]   ;;  %s966_s3 = inlined_call_operand.vmem [shape: f32[64,32], index: 3, kind: input, shape index: {}]   ;;  %s967_s4 = inlined_call_operand.vmem [shape: f32[1,64], index: 4, kind: input, shape index: {}]   ;;  %s968_s5 = inlined_call_operand.hbm [shape: f32[2,8,64], index: 5, kind: output, shape index: {}]  }
   0x1   :  { %12 = vsyncpa [#allocation3 + $0x1], 0  ;;  %s822_s18 = smov 0   ;;  %s824_s19 = smov 0  }
   0x2   :  { %s826_s20 = smov 0   ;;  %s828_s21 = smov 0  }
   0x3   :  { %s830_s22 = smov 0   ;;  %s832_s23 = smov 0  }
   0x4 LB: > { %s601_s24 = sadd.s32 4294967295, %s787_s23   ;;  %s602_s25 = sadd.s32 4294967294, %s787_s23   ;;  %s787_s23 = sphi %s832_s23, %s18_s23   ;;  %s783_s22 = sphi %s830_s22, %s975_s22   ;;  %s779_s21 = sphi %s828_s21, %s974_s21   ;;  %s775_s20 = sphi %s826_s20, %s973_s20   ;;  %s771_s19 = sphi %s824_s19, %s972_s19   ;;  %s767_s18 = sphi %s822_s18, %s971_s18  }
   0x5   : > { %s37_s26 = sadd.s32 1, %s783_s22  ;;  %s182_s27 = sadd.s32 1, %s775_s20 }
   0x6   : > { %p39_p0 = scmp.ge.s32.totalorder %s37_s26, 2  ;;  %p192_p1 = scmp.ne.s32.totalorder %s775_s20, %s771_s19 }
   0x7   : > { %p193_p2 = scmp.eq.s32.totalorder %s601_s24, 1  ;;  %p198_p3 = scmp.ne.s32.totalorder %s771_s19, %s767_s18 }
   0x8   : > { %s977_s26 = smov (%p39_p0, %s37_s26), 0  ;;  %p199_p5 = scmp.eq.s32.totalorder %s602_s25, 1 }
   0x9   : > { %p862_p4 = por %p193_p2, %p192_p1  ;;  %s175_s29 = ssub.s32 %s783_s22, %s977_s26 }
   0xa   : > { %p607_p6 = scmp.ge.s32.totalorder %s787_s23, 1  ;;  %p180_p7 = scmp.eq.s32.totalorder %s175_s29, 0 }
   0xb   : > { %p869_p8 = por %p199_p5, %p198_p3  ;;  %p257_p9 = scmp.lt.s32.totalorder %s787_s23, 3 }
   0xc   : > { %s875_s6 = scalar_select %p180_p7, %s775_s20, %s182_s27  }
   0xd   : > { %p258_p10 = pnand %p607_p6, %p257_p9 }
   0xe   : > { %p304_p11 = scmp.lt.s32.totalorder (!%p258_p10), %s779_s21, 1  ;;  %s301_s16 = sand.u32 (!%p258_p10), 1, %s771_s19  }
   0xf   : > { %261 = sbr.rel (%p258_p10) target bundleno = 263 (0x107), region = 40  ;;  %s608_s24 = sshll.u32 (!%p258_p10), %s301_s16, 3 }
  0x10   : > { %s623_s9 = sshll.u32 (!%p258_p10), %s779_s21, 7  ;;  %s791_s25 = smov (!%p258_p10), [#allocation2]  }
  0x11   : > { %s476_s14 = scalar_lea.hbm (!%p258_p10), %s968_s5, %s623_s9 }
  0x14   : > { %v345_v0 = vld [vmem:[%s966_s3 + $0x38] sm:$0xff]  ;;  %vm346_vm0 = vcmask 261120   ;;  %v789_v1 = vmov 0.0   ;;  %vm790_vm1 = vmmov 0   ;;  %v344_v2 = vld [vmem:[%s966_s3 + $0x30] sm:$0xff]  ;;  %v343_v3 = vld [vmem:[%s966_s3 + $0x28] sm:$0xff] }
  0x15   : > { %635 = vmatprep.subr.mxu0 %v789_v1  ;;  %651 = vmatprep.mubr.msk.f32.mxu0 %vm790_vm1, %v789_v1  ;;  %v342_v4 = vld [vmem:[%s966_s3 + $0x20] sm:$0xff]  ;;  %v341_v5 = vld [vmem:[%s966_s3 + $0x18] sm:$0xff]  ;;  %s305_s17 = scalar_select %p304_p11, %s779_s21, 1  ;;  %v340_v6 = vld [vmem:[%s966_s3 + $0x10] sm:$0xff]  ;;  %vm460_vm2 = vcmask 523264  }
  0x16   : > { %636 = vmatpush3.xpose.msk.msra.mxu0 %vm346_vm0, %v345_v0  ;;  %v339_v7 = vld [vmem:[%s966_s3 + $0x8] sm:$0xff]  ;;  %v338_v10 = vld [vmem:[%s966_s3] sm:$0xff]  ;;  %s715_s21 = sshll.u32 %s791_s25, 4  ;;  %s716_s21 = int_to_ptr.vmem [resolvable:$false] %s715_s21 }
  0x17   : > { %637 = vmatprep.subr.mxu0 %v789_v1  ;;  %s609_s27 = sshll.u32 %s305_s17, 3  ;;  %s313_s13 = scalar_lea.vmem %s964_s1, %s305_s17  ;;  %v621_v14 = vld [vmem:[%s967_s4] ss:$0 sm:$0xff] }
  0x18   : > { %s310_s10 = scalar_lea.vmem %s963_s0, %s609_s27  ;;  %v610_v9 = vld [vmem:[%s313_s13] ss:$0 sm:$0xff]  ;;  %s319_s29 = scalar_lea.vmem %s965_s2, %s305_s17 }
  0x19   : > { %v329_v8 = vld [vmem:[%s310_s10] sm:$0xff]  ;;  %s303_s10 = scalar_lea.vmem [#allocation2], %s608_s24  ;;  %s463_s17 = scalar_lea.sflag [#allocation3], %s301_s16 }
  0x1a   : > { %638 = vmatpush3.xpose.msk.msra.mxu0 %vm346_vm0, %v344_v2  ;;  %v337_v11 = vmul.f32 %v610_v9, %v329_v8  ;;  %v620_v12 = vld [vmem:[%s319_s29] ss:$0 sm:$0xff]  ;;  %s478_s11 = sshll.u32 %s303_s10, 4  ;;  %s717_s24 = scalar_lea.vmem %s716_s21, 256  ;;  %s479_s11 = int_to_ptr.vmem [resolvable:$true] %s478_s11 }
  0x1b   : > { %639 = vmatprep.subr.mxu0 %v789_v1  ;;  %s711_s15 = scalar_lea.vmem %s479_s11, 128  ;;  %p718_p1 = scmp.lt.s32.totalorder %s479_s11, %s716_s21 }
  0x1c   : > { %p712_p12 = scmp.ne.s32.totalorder %s479_s11, %s711_s15  ;;  %p719_p2 = scmp.lt.s32.totalorder %s717_s24, %s711_s15 }
  0x1e   : > { %640 = vmatpush3.xpose.msk.msra.mxu0 %vm346_vm0, %v343_v3  ;;  %p713_p13 = pnand %p712_p12, %p862_p4  ;;  %p720_p3 = por %p719_p2, %p718_p1 }
  0x1f   : > { %641 = vmatprep.subr.mxu0 %v789_v1 }
  0x20   : > { %p714_p0 = pneg %p713_p13 }
  0x22   : > { %642 = vmatpush3.xpose.msk.msra.mxu0 %vm346_vm0, %v342_v4  ;;  %p721_p5 = pnand %p720_p3, %p714_p0 }
  0x23   : > { %643 = vmatprep.subr.mxu0 %v789_v1 }
  0x26   : > { %644 = vmatpush3.xpose.msk.msra.mxu0 %vm346_vm0, %v341_v5 }
  0x27   : > { %645 = vmatprep.subr.mxu0 %v789_v1 }
  0x2a   : > { %646 = vmatpush3.xpose.msk.msra.mxu0 %vm346_vm0, %v340_v6 }
  0x2b   : > { %647 = vmatprep.subr.mxu0 %v789_v1 }
  0x2e   : > { %648 = vmatpush3.xpose.msk.msra.mxu0 %vm346_vm0, %v339_v7 }
  0x2f   : > { %649 = vmatprep.subr.mxu0 %v789_v1 }
  0x32   : > { %650 = vmatpush3.xpose.msk.msra.mxu0 %vm346_vm0, %v338_v10 }
  0x35   : > { %652 = vmatmul.mubr.msk.f32.vlgmr.msra.gmra.mxu0 %vm346_vm0, %v337_v11 }
  0xf5   : > { %v440_v13 = vpop.f32.mrf.mxu0 }
  0xf6   : > { %v451_v15 = vmul.f32 %v620_v12, %v440_v13 }
  0xf7   : > { %v653_v16 = vpop.f32.mrf.mxu0 }
  0xf8   : > { %v459_v17 = vadd.f32 %v621_v14, %v451_v15 }
  0xfa   : > { %461 = vst.msk [vmem:[%s303_s10] sm:$0xff] %vm460_vm2, %v459_v17 }
  0xfb   : > { %724 = shalt.err (!%p721_p5)
}
  0xfc   : > { %s725_s27 = scalar_lea.hbm %s476_s14, 128  ;;  %s729_s7 = scalar_lea.hbm %s968_s5, 256 }
  0xfd   : > { %p726_p6 = scmp.ne.s32.totalorder %s476_s14, %s725_s27  ;;  %p730_p10 = scmp.lt.s32.totalorder %s476_s14, %s968_s5 }
  0xfe   : > { %p731_p11 = scmp.lt.s32.totalorder %s729_s7, %s725_s27 }
  0xff   : > { %p727_p7 = pnand %p726_p6, %p862_p4 }
 0x100   : > { %p732_p12 = por %p731_p11, %p730_p10 }
 0x101   : > { %p728_p9 = pneg %p727_p7 }
 0x103   : > { %p733_p13 = pnand %p732_p12, %p728_p9 }
 0x105   : > { %736 = shalt.err (!%p733_p13)
}
 0x106   : > { %654 = dma.vmem_to_hbm [thread:$0]  (%p862_p4), %s479_s11, 128, %s476_s14, %s463_s17  }
 0x107 PF: > { %p660_p0 = scmp.ge.s32.totalorder %s787_s23, 2  ;;  %s490_s10 = sand.u32 1, %s767_s18  }
 0x108   : > { %s491_s12 = scalar_lea.sflag [#allocation3], %s490_s10 }
 0x109   : > { %p657_p1 = pnand %p660_p0, %p869_p8 }
 0x10b   : > { %p658_p2 = pneg %p657_p1 }
 0x10d   : > { %762 = dma.done.wait (%p658_p2), %s491_s12, 128  }
 0x10e   : > { %764 = vsyncadd (%p658_p2), %s491_s12, 4294967168  ;;  %s18_s23 = sadd.s32 1, %s787_s23   ;;  %s971_s18 = smov %s771_s19 }
 0x10f   : > { %p15_p3 = scmp.ge.s32.totalorder %s18_s23, 4   ;;  %s972_s19 = smov %s775_s20 }
 0x110   : > { %s973_s20 = smov %s875_s6  ;;  %s974_s21 = smov %s783_s22 }
 0x111   : > { %s975_s22 = smov %s977_s26  ;;  %17 = sbr.rel (!%p15_p3) target bundleno = 4 (0x4), region = 87 }
 0x116   :  { %496 = vsyncpa [#allocation3], 1 }
 0x117   :  { %498 = vsyncpa [#allocation3 + $0x1], 1 }

</bundles_post_ra>
